<compile_context>
chip_gen: v6e
topology: v6e:2x2x1
jax: 0.10.0
libtpu: 0.0.40
codegen_flags: <defaults>
</compile_context>

<pallas_src>
import functools

import jax
import jax.numpy as jnp
from jax import lax
from jax.experimental import pallas as pl
from jax.experimental.pallas import tpu as pltpu


# dot_general dimension numbers contracting the last axis of both operands
# (the "trans_b" form used by the TPU flash-attention kernels): avoids an
# explicit in-kernel transpose of the x tile.
_CONTRACT_LAST = (((1,), (1,)), ((), ()))


def mlp_kernel(x_ref, w1t_ref, b1_ref, w2_ref, b2_ref, o_ref):
    # linear1 on the MXU, batch on lanes: (H, D) x (TB, D)^T -> (H, TB), f32 acc.
    h_t = lax.dot_general(
        w1t_ref[...], x_ref[...], _CONTRACT_LAST,
        preferred_element_type=jnp.float32,
    )
    # bias + ReLU on the VPU (b1 is an (H, 1) column, broadcast along lanes).
    h_t = jnp.maximum(h_t + b1_ref[...], 0.0)
    # linear2 (output width 1): VPU multiply by the (H, 1) w2 column + XLU
    # cross-sublane reduce; keepdims yields the lane-dense (1, TB) row directly.
    y = jnp.sum(h_t * w2_ref[...], axis=0, keepdims=True)        # (1, TB)
    y = y + b2_ref[0]                                            # SMEM scalar bias
    # Sigmoid epilogue in f32 (exp / reciprocal go to the EUP slot).
    o_ref[...] = jax.nn.sigmoid(y).astype(o_ref.dtype)


@functools.partial(jax.jit, static_argnames=("block_b",))
def neural_net_forward(x, w1, b1, w2, b2, *, block_b=512):
    """Forward pass of NeuralNet. x: (B, D) f32 -> (B, 1) f32."""
    B, D = x.shape
    H = w1.shape[1]

    # Batch tile: as large as practical (>=512 per the tile-size sweep) to
    # amortize the ~0.35us/step pipeline overhead; whole batch if it is small.
    # When tiling (tb < B) keep tb a multiple of 128 so the lane-dense (1, tb)
    # output block satisfies the (8, 128) rule.
    if B <= block_b:
        tb = B
    else:
        tb = (block_b // 128) * 128

    grid = (pl.cdiv(B, tb),)

    w1t = w1.T                  # (H, D): kernel produces h with batch on lanes
    b1_col = b1.reshape(H, 1)   # (H, 1) resident VMEM column
    w2_col = w2.reshape(H, 1)   # (H, 1) resident VMEM column (original layout)
    b2_s = b2.reshape(1)        # (1,)   SMEM scalar

    out_row = pl.pallas_call(
        mlp_kernel,
        out_shape=jax.ShapeDtypeStruct((1, B), jnp.float32),
        grid=grid,
        in_specs=[
            pl.BlockSpec((tb, D), lambda i: (i, 0)),             # x: tiled over batch
            pl.BlockSpec((H, D), lambda i: (0, 0)),              # w1^T: resident
            pl.BlockSpec((H, 1), lambda i: (0, 0)),              # b1:   resident
            pl.BlockSpec((H, 1), lambda i: (0, 0)),              # w2:   resident
            pl.BlockSpec(memory_space=pltpu.MemorySpace.SMEM),   # b2: SMEM scalar
        ],
        out_specs=pl.BlockSpec((1, tb), lambda i: (0, i)),       # lane-dense output
        compiler_params=pltpu.CompilerParams(
            dimension_semantics=("parallel",),                   # v7x: shard over 2 TCs
        ),
    )(x, w1t, b1_col, w2_col, b2_s)

    # (1, B) -> (B, 1): identical row-major layout, zero-cost reshape.
    return out_row.reshape(B, 1)


def init_params(key, input_size, hidden_size):
    # nn.Linear default init: U(-1/sqrt(fan_in), 1/sqrt(fan_in))
    k1, k2, k3, k4 = jax.random.split(key, 4)
    bound1 = 1.0 / jnp.sqrt(jnp.float32(input_size))
    bound2 = 1.0 / jnp.sqrt(jnp.float32(hidden_size))
    w1 = jax.random.uniform(k1, (input_size, hidden_size), jnp.float32, -bound1, bound1)
    b1 = jax.random.uniform(k2, (hidden_size,), jnp.float32, -bound1, bound1)
    w2 = jax.random.uniform(k3, (hidden_size, 1), jnp.float32, -bound2, bound2)
    b2 = jax.random.uniform(k4, (1,), jnp.float32, -bound2, bound2)
    return w1, b1, w2, b2


if __name__ == "__main__":
    # Small feature sizes per the module; batch large enough that the grid has
    # more than one step (2 tiles of 512 rows) so the pipeline actually engages.
    batch = 1024
    input_size = 16
    hidden_size = 32

    key = jax.random.PRNGKey(0)
    kx, kp = jax.random.split(key)
    x = jax.random.normal(kx, (batch, input_size), jnp.float32)
    w1, b1, w2, b2 = init_params(kp, input_size, hidden_size)

    out = neural_net_forward(x, w1, b1, w2, b2)
    out = jax.block_until_ready(out)

    # Pure-JAX reference check.
    ref = jax.nn.sigmoid(jnp.maximum(x @ w1 + b1, 0.0) @ w2 + b2)
    assert out.shape == (batch, 1)
    assert jnp.allclose(out, ref, atol=1e-5, rtol=1e-5)

    print("KERNEL_OK")
</pallas_src>

<mosaic_0001>
module attributes {stable_mosaic.version = 11 : i64} {
  func.func @mlp_kernel(%arg0: i32, %arg1: memref<512x16xf32, #tpu.memory_space<vmem>>, %arg2: memref<32x16xf32, #tpu.memory_space<vmem>>, %arg3: memref<32x1xf32, #tpu.memory_space<vmem>>, %arg4: memref<32x1xf32, #tpu.memory_space<vmem>>, %arg5: memref<1xf32, #tpu.memory_space<smem>>, %arg6: memref<1x512xf32, #tpu.memory_space<vmem>>) attributes {dimension_semantics = [#tpu.dimension_semantics<parallel>], iteration_bounds = array<i64: 2>, scalar_prefetch = 0 : i64, scratch_operands = 0 : i64, tpu.core_type = #tpu.core_type<tc>, window_params = [{transform_indices = @transform_0, window_bounds = array<i64: 512, 16>}, {pipeline_mode = #tpu.pipeline_mode<synchronous>, transform_indices = @transform_1, window_bounds = array<i64: 32, 16>}, {pipeline_mode = #tpu.pipeline_mode<synchronous>, transform_indices = @transform_2, window_bounds = array<i64: 32, 1>}, {pipeline_mode = #tpu.pipeline_mode<synchronous>, transform_indices = @transform_3, window_bounds = array<i64: 32, 1>}, {transform_indices = @transform_4, window_bounds = array<i64: 1>}, {transform_indices = @transform_5, window_bounds = array<i64: 1, 512>}]} {
    %c0 = arith.constant 0 : index
    %c0_0 = arith.constant 0 : index
    %0 = vector.load %arg2[%c0, %c0_0] : memref<32x16xf32, #tpu.memory_space<vmem>>, vector<32x16xf32>
    %c0_1 = arith.constant 0 : index
    %c0_2 = arith.constant 0 : index
    %1 = vector.load %arg1[%c0_1, %c0_2] : memref<512x16xf32, #tpu.memory_space<vmem>>, vector<512x16xf32>
    %cst = arith.constant dense<0.000000e+00> : vector<32x512xf32>
    %2 = tpu.matmul %0, %1, %cst {dimension_numbers = #tpu.dot_dimension_numbers<[1], [1], [0], [0], [0, 0, 1, 0], [], []>} : vector<32x16xf32>, vector<512x16xf32>, vector<32x512xf32> -> vector<32x512xf32>
    %c0_3 = arith.constant 0 : index
    %c0_4 = arith.constant 0 : index
    %3 = vector.load %arg3[%c0_3, %c0_4] : memref<32x1xf32, #tpu.memory_space<vmem>>, vector<32x1xf32>
    %4 = vector.broadcast %3 : vector<32x1xf32> to vector<32x512xf32>
    %5 = arith.addf %2, %4 : vector<32x512xf32>
    %cst_5 = arith.constant 0.000000e+00 : f32
    %6 = vector.broadcast %cst_5 : f32 to vector<32x512xf32>
    %7 = arith.maximumf %5, %6 : vector<32x512xf32>
    %c0_6 = arith.constant 0 : index
    %c0_7 = arith.constant 0 : index
    %8 = vector.load %arg4[%c0_6, %c0_7] : memref<32x1xf32, #tpu.memory_space<vmem>>, vector<32x1xf32>
    %9 = vector.broadcast %8 : vector<32x1xf32> to vector<32x512xf32>
    %10 = arith.mulf %7, %9 : vector<32x512xf32>
    %cst_8 = arith.constant dense<0.000000e+00> : vector<512xf32>
    %11 = vector.multi_reduction <add>, %10, %cst_8 [0] : vector<32x512xf32> to vector<512xf32>
    %12 = vector.shape_cast %11 : vector<512xf32> to vector<1x512xf32>
    %c0_9 = arith.constant 0 : index
    %13 = memref.load %arg5[%c0_9] : memref<1xf32, #tpu.memory_space<smem>>
    %14 = vector.broadcast %13 : f32 to vector<1x512xf32>
    %15 = arith.addf %12, %14 : vector<1x512xf32>
    %16 = arith.negf %15 : vector<1x512xf32>
    %17 = math.exp %16 : vector<1x512xf32>
    %cst_10 = arith.constant 1.000000e+00 : f32
    %18 = vector.broadcast %cst_10 : f32 to vector<1x512xf32>
    %19 = arith.addf %18, %17 : vector<1x512xf32>
    %20 = arith.divf %18, %19 : vector<1x512xf32>
    %c0_11 = arith.constant 0 : index
    %c0_12 = arith.constant 0 : index
    %21 = vector.load %arg6[%c0_11, %c0_12] : memref<1x512xf32, #tpu.memory_space<vmem>>, vector<1x512xf32>
    tpu.vector_store %arg6[%c0_11, %c0_12], %20 {strides = array<i32>} : memref<1x512xf32, #tpu.memory_space<vmem>>, vector<1x512xf32>,
    return
  }
  func.func @transform_0(%arg0: i32) -> (i32, i32) {
    %c0_i32 = arith.constant 0 : i32
    %c0_i32_0 = arith.constant 0 : i32
    return %arg0, %c0_i32 : i32, i32
  }
  func.func @transform_1(%arg0: i32) -> (i32, i32) {
    %c0_i32 = arith.constant 0 : i32
    %c0_i32_0 = arith.constant 0 : i32
    %c0_i32_1 = arith.constant 0 : i32
    return %c0_i32, %c0_i32_0 : i32, i32
  }
  func.func @transform_2(%arg0: i32) -> (i32, i32) {
    %c0_i32 = arith.constant 0 : i32
    %c0_i32_0 = arith.constant 0 : i32
    %c0_i32_1 = arith.constant 0 : i32
    return %c0_i32, %c0_i32_0 : i32, i32
  }
  func.func @transform_3(%arg0: i32) -> (i32, i32) {
    %c0_i32 = arith.constant 0 : i32
    %c0_i32_0 = arith.constant 0 : i32
    %c0_i32_1 = arith.constant 0 : i32
    return %c0_i32, %c0_i32_0 : i32, i32
  }
  func.func @transform_4(%arg0: i32) -> i32 {
    %c0_i32 = arith.constant 0 : i32
    %c0_i32_0 = arith.constant 0 : i32
    return %c0_i32 : i32
  }
  func.func @transform_5(%arg0: i32) -> (i32, i32) {
    %c0_i32 = arith.constant 0 : i32
    %c0_i32_0 = arith.constant 0 : i32
    return %c0_i32, %arg0 : i32, i32
  }
}

</mosaic_0001>

<bundles_post_ra>
// kernel: neural_net_forward.1
= control target key start
LH: loop header
LB: loop body
LE: loop exit
PB: predicated region body
PF: predicated region fallthrough
CT: control target
= control target key end

     0   :  { %s1532_s0 = inlined_call_operand.vmem [shape: f32[1024,16], index: 0, kind: input, shape index: {}]   ;;  %s1533_s1 = inlined_call_operand.vmem [shape: f32[32,16], index: 1, kind: input, shape index: {}]   ;;  %s1534_s2 = inlined_call_operand.vmem [shape: f32[32,1], index: 2, kind: input, shape index: {}]   ;;  %s1535_s3 = inlined_call_operand.vmem [shape: f32[32,1], index: 3, kind: input, shape index: {}]   ;;  %s1536_s4 = inlined_call_operand.<no memory space> [shape: f32[1], index: 4, kind: input, shape index: {}]   ;;  %s1537_s5 = inlined_call_operand.hbm [shape: f32[1,1024], index: 5, kind: output, shape index: {}]  }
   0x1   :  { %10 = sst [smem:[#allocation2]] %s1536_s4 }
   0x2   :  { %11 = vsyncpa [#allocation4], 0 }
   0x3   :  { %13 = vsyncpa [#allocation4 + $0x1], 0  ;;  %s1258_s20 = smov 0   ;;  %s1260_s21 = smov 0  }
   0x4   :  { %s1262_s22 = smov 0   ;;  %s1264_s23 = smov 0  }
   0x5 LB: > { %s931_s4 = sadd.s32 4294967295, %s1220_s23   ;;  %s932_s24 = sadd.s32 4294967294, %s1220_s23   ;;  %s1220_s23 = sphi %s1264_s23, %s1543_s23   ;;  %s1216_s22 = sphi %s1262_s22, %s1542_s22   ;;  %s1212_s21 = sphi %s1260_s21, %s1541_s21   ;;  %s1208_s20 = sphi %s1258_s20, %s1540_s20  }
   0x6   : > { %s1281_s25 = sadd.s32 1, %s1220_s23   ;;  %s136_s26 = sadd.s32 1, %s1216_s22 }
   0x7   : > { %s133_s27 = ssub.s32 %s1220_s23, %s1281_s25  ;;  %p146_p0 = scmp.ne.s32.totalorder %s1216_s22, %s1212_s21 }
   0x8   : > { %p134_p1 = scmp.eq.s32.totalorder %s133_s27, 0  ;;  %p147_p2 = scmp.eq.s32.totalorder %s931_s4, 1 }
   0x9   : > { %p152_p3 = scmp.ne.s32.totalorder %s1212_s21, %s1208_s20  ;;  %p153_p4 = scmp.eq.s32.totalorder %s932_s24, 1 }
   0xa   : > { %s1291_s28 = scalar_select %p134_p1, %s1216_s22, %s136_s26  }
   0xb   : > { %p1293_p5 = por %p147_p2, %p146_p0  ;;  %p1297_p6 = por %p153_p4, %p152_p3 }
   0xc   : > { %p935_p7 = scmp.ge.s32.totalorder %s1220_s23, 1  ;;  %p192_p8 = scmp.lt.s32.totalorder %s1220_s23, 3 }
   0xe   : > { %p193_p9 = pnand %p935_p7, %p192_p8 }
   0xf   : > { %s1303_s6 = sshll.u32 (!%p193_p9), %s931_s4, 6  ;;  %s794_s19 = sld [smem:[#allocation2]] (!%p193_p9) }
  0x10   : > { %196 = sbr.rel (%p193_p9) target bundleno = 376 (0x178), region = 40  ;;  %p221_p10 = scmp.lt.s32.totalorder (!%p193_p9), %s1303_s6, 127 }
  0x11   : > { %s217_s4 = sand.u32 (!%p193_p9), 1, %s1212_s21   ;;  %s871_s9 = scalar_lea.hbm (!%p193_p9), %s1537_s5, %s1303_s6 }
  0x12   : > { %s859_s10 = scalar_lea.sflag (!%p193_p9), [#allocation4], %s217_s4  ;;  %s1224_s12 = smov (!%p193_p9), [#allocation3]  }
  0x15   : > { %vm319_vm0 = vcmask 130048   ;;  %v1308_v0 = vld [vmem:[%s1533_s1] sm:$0xff]  ;;  %v297_v2 = vld [vmem:[%s1534_s2 + $0x10] sm:$0xff]  ;;  %v1222_v3 = vmov 0   ;;  %s222_s13 = scalar_select %p221_p10, %s1303_s6, 127  ;;  %v296_v4 = vld [vmem:[%s1534_s2 + $0x8] sm:$0xff] }
  0x16   : > { %1053 = vmatprep.mubr.msk.f32.mxu0 %vm319_vm0, %v1308_v0  ;;  %1093 = vmatprep.mubr.msk.f32.mxu1 %vm319_vm0, %v1308_v0  ;;  %v295_v1 = vld [vmem:[%s1534_s2] sm:$0xff]  ;;  %v298_v5 = vld [vmem:[%s1534_s2 + $0x18] sm:$0xff]  ;;  %v719_v7 = vld [vmem:[%s1535_s3 + $0x8] sm:$0xff] }
  0x17   : > { %1142 = vset.pattern.permute.xlu0 %v1222_v3  ;;  %1143 = vset.pattern.permute.xlu1 %v1222_v3  ;;  %s938_s18 = sshll.u32 %s222_s13, 3  ;;  %v718_v6 = vld [vmem:[%s1535_s3] sm:$0xff]  ;;  %v720_v18 = vld [vmem:[%s1535_s3 + $0x10] sm:$0xff]  ;;  %v721_v19 = vld [vmem:[%s1535_s3 + $0x18] sm:$0xff]  ;;  %s1164_s13 = sshll.u32 %s1224_s12, 4  ;;  %s1165_s13 = int_to_ptr.vmem [resolvable:$false] %s1164_s13 }
  0x18   : > { %301 = vperm.xlu0 %1142, %v295_v1   ;;  %311 = vperm.xlu1 %1143, %v297_v2   ;;  %s1331_s24 = scalar_lea.vmem %s1532_s0, %s938_s18  ;;  %s1166_s14 = scalar_lea.vmem %s1165_s13, 128 }
  0x19   : > { %v262_v8 = vld [vmem:[%s1331_s24 + $0xf8] sm:$0xff]  ;;  %v261_v12 = vld [vmem:[%s1331_s24 + $0xf0] sm:$0xff]  ;;  %v260_v16 = vld [vmem:[%s1331_s24 + $0xe8] sm:$0xff] }
  0x1a   : > { %v294_v9 = vld [vmem:[%s1331_s24 + $0x1f8] sm:$0xff]  ;;  %1021 = vmatprep.subr.msk.mxu0 %vm319_vm0, %v262_v8  ;;  %v293_v13 = vld [vmem:[%s1331_s24 + $0x1f0] sm:$0xff]  ;;  %v292_v17 = vld [vmem:[%s1331_s24 + $0x1e8] sm:$0xff] }
  0x1b   : > { %v246_v10 = vld [vmem:[%s1331_s24 + $0x78] sm:$0xff]  ;;  %1061 = vmatprep.subr.msk.mxu1 %vm319_vm0, %v294_v9  ;;  %v245_v14 = vld [vmem:[%s1331_s24 + $0x70] sm:$0xff]  ;;  %v244_v20 = vld [vmem:[%s1331_s24 + $0x68] sm:$0xff] }
  0x1c   : > { %306 = vperm.xlu0 %1142, %v296_v4   ;;  %316 = vperm.xlu1 %1143, %v298_v5   ;;  %v278_v11 = vld [vmem:[%s1331_s24 + $0x178] sm:$0xff]  ;;  %v277_v15 = vld [vmem:[%s1331_s24 + $0x170] sm:$0xff]  ;;  %v276_v21 = vld [vmem:[%s1331_s24 + $0x168] sm:$0xff] }
  0x1d   : > { %1022 = vmatpush3.xpose.msk.msra.mxu0 %vm319_vm0, %v246_v10  ;;  %1062 = vmatpush3.xpose.msk.msra.mxu1 %vm319_vm0, %v278_v11  ;;  %v259_v22 = vld [vmem:[%s1331_s24 + $0xe0] sm:$0xff]  ;;  %v258_v26 = vld [vmem:[%s1331_s24 + $0xd8] sm:$0xff]  ;;  %v257_v30 = vld [vmem:[%s1331_s24 + $0xd0] sm:$0xff] }
  0x1e   : > { %1023 = vmatprep.subr.msk.mxu0 %vm319_vm0, %v261_v12  ;;  %1063 = vmatprep.subr.msk.mxu1 %vm319_vm0, %v293_v13  ;;  %v291_v23 = vld [vmem:[%s1331_s24 + $0x1e0] sm:$0xff]  ;;  %v290_v27 = vld [vmem:[%s1331_s24 + $0x1d8] sm:$0xff]  ;;  %v289_v31 = vld [vmem:[%s1331_s24 + $0x1d0] sm:$0xff] }
  0x1f   : > { %v243_v24 = vld [vmem:[%s1331_s24 + $0x60] sm:$0xff]  ;;  %v242_v28 = vld [vmem:[%s1331_s24 + $0x58] sm:$0xff]  ;;  %v241_v32 = vld [vmem:[%s1331_s24 + $0x50] sm:$0xff] }
  0x20   : > { %724 = vperm.xlu0 %1142, %v718_v6   ;;  %729 = vperm.xlu1 %1143, %v719_v7   ;;  %v275_v25 = vld [vmem:[%s1331_s24 + $0x160] sm:$0xff]  ;;  %v274_v29 = vld [vmem:[%s1331_s24 + $0x158] sm:$0xff]  ;;  %v273_v33 = vld [vmem:[%s1331_s24 + $0x150] sm:$0xff] }
  0x21   : > { %1024 = vmatpush3.xpose.msk.msra.mxu0 %vm319_vm0, %v245_v14  ;;  %1064 = vmatpush3.xpose.msk.msra.mxu1 %vm319_vm0, %v277_v15  ;;  %v256_v34 = vld [vmem:[%s1331_s24 + $0xc8] sm:$0xff]  ;;  %v255_v38 = vld [vmem:[%s1331_s24 + $0xc0] sm:$0xff]  ;;  %v254_v42 = vld [vmem:[%s1331_s24 + $0xb8] sm:$0xff] }
  0x22   : > { %1025 = vmatprep.subr.msk.mxu0 %vm319_vm0, %v260_v16  ;;  %1065 = vmatprep.subr.msk.mxu1 %vm319_vm0, %v292_v17  ;;  %v288_v35 = vld [vmem:[%s1331_s24 + $0x1c8] sm:$0xff]  ;;  %v287_v39 = vld [vmem:[%s1331_s24 + $0x1c0] sm:$0xff]  ;;  %v286_v43 = vld [vmem:[%s1331_s24 + $0x1b8] sm:$0xff] }
  0x23   : > { %v240_v36 = vld [vmem:[%s1331_s24 + $0x48] sm:$0xff]  ;;  %v239_v40 = vld [vmem:[%s1331_s24 + $0x40] sm:$0xff]  ;;  %v238_v44 = vld [vmem:[%s1331_s24 + $0x38] sm:$0xff] }
  0x24   : > { %734 = vperm.xlu0 %1142, %v720_v18   ;;  %739 = vperm.xlu1 %1143, %v721_v19   ;;  %v272_v37 = vld [vmem:[%s1331_s24 + $0x148] sm:$0xff]  ;;  %v271_v41 = vld [vmem:[%s1331_s24 + $0x140] sm:$0xff]  ;;  %v270_v45 = vld [vmem:[%s1331_s24 + $0x138] sm:$0xff] }
  0x25   : > { %1026 = vmatpush3.xpose.msk.msra.mxu0 %vm319_vm0, %v244_v20  ;;  %1066 = vmatpush3.xpose.msk.msra.mxu1 %vm319_vm0, %v276_v21  ;;  %v253_v46 = vld [vmem:[%s1331_s24 + $0xb0] sm:$0xff]  ;;  %v252_v50 = vld [vmem:[%s1331_s24 + $0xa8] sm:$0xff]  ;;  %v251_v54 = vld [vmem:[%s1331_s24 + $0xa0] sm:$0xff] }
  0x26   : > { %1027 = vmatprep.subr.msk.mxu0 %vm319_vm0, %v259_v22  ;;  %1067 = vmatprep.subr.msk.mxu1 %vm319_vm0, %v291_v23  ;;  %v285_v47 = vld [vmem:[%s1331_s24 + $0x1b0] sm:$0xff]  ;;  %v284_v51 = vld [vmem:[%s1331_s24 + $0x1a8] sm:$0xff]  ;;  %v283_v55 = vld [vmem:[%s1331_s24 + $0x1a0] sm:$0xff] }
  0x27   : > { %v237_v48 = vld [vmem:[%s1331_s24 + $0x30] sm:$0xff]  ;;  %v236_v52 = vld [vmem:[%s1331_s24 + $0x28] sm:$0xff]  ;;  %v235_v56 = vld [vmem:[%s1331_s24 + $0x20] sm:$0xff] }
  0x28   : > { %v269_v49 = vld [vmem:[%s1331_s24 + $0x130] sm:$0xff]  ;;  %v268_v53 = vld [vmem:[%s1331_s24 + $0x128] sm:$0xff]  ;;  %v267_v57 = vld [vmem:[%s1331_s24 + $0x120] sm:$0xff] }
  0x29   : > { %1028 = vmatpush3.xpose.msk.msra.mxu0 %vm319_vm0, %v243_v24  ;;  %1068 = vmatpush3.xpose.msk.msra.mxu1 %vm319_vm0, %v275_v25  ;;  %v250_v58 = vld [vmem:[%s1331_s24 + $0x98] sm:$0xff]  ;;  %v249_v62 = vld [vmem:[%s1331_s24 + $0x90] sm:$0xff]  ;;  %v248_v3 = vld [vmem:[%s1331_s24 + $0x88] sm:$0xff] }
  0x2a   : > { %1029 = vmatprep.subr.msk.mxu0 %vm319_vm0, %v258_v26  ;;  %1069 = vmatprep.subr.msk.mxu1 %vm319_vm0, %v290_v27  ;;  %v282_v59 = vld [vmem:[%s1331_s24 + $0x198] sm:$0xff]  ;;  %v281_v63 = vld [vmem:[%s1331_s24 + $0x190] sm:$0xff]  ;;  %v280_v4 = vld [vmem:[%s1331_s24 + $0x188] sm:$0xff] }
  0x2b   : > { %v234_v60 = vld [vmem:[%s1331_s24 + $0x18] sm:$0xff]  ;;  %v233_v1 = vld [vmem:[%s1331_s24 + $0x10] sm:$0xff]  ;;  %v232_v5 = vld [vmem:[%s1331_s24 + $0x8] sm:$0xff] }
  0x2c   : > { %v266_v61 = vld [vmem:[%s1331_s24 + $0x118] sm:$0xff]  ;;  %v265_v2 = vld [vmem:[%s1331_s24 + $0x110] sm:$0xff]  ;;  %v264_v6 = vld [vmem:[%s1331_s24 + $0x108] sm:$0xff] }
  0x2d   : > { %1030 = vmatpush3.xpose.msk.msra.mxu0 %vm319_vm0, %v242_v28  ;;  %1070 = vmatpush3.xpose.msk.msra.mxu1 %vm319_vm0, %v274_v29  ;;  %v247_v7 = vld [vmem:[%s1331_s24 + $0x80] sm:$0xff]  ;;  %v228_v11 = vld [vmem:[%s1533_s1 + $0x8] sm:$0xff]  ;;  %v229_v12 = vld [vmem:[%s1533_s1 + $0x10] sm:$0xff] }
  0x2e   : > { %1031 = vmatprep.subr.msk.mxu0 %vm319_vm0, %v257_v30  ;;  %1071 = vmatprep.subr.msk.mxu1 %vm319_vm0, %v289_v31  ;;  %v279_v8 = vld [vmem:[%s1331_s24 + $0x180] sm:$0xff] }
  0x2f   : > { %v231_v9 = vld [vmem:[%s1331_s24] sm:$0xff] }
  0x30   : > { %v263_v10 = vld [vmem:[%s1331_s24 + $0x100] sm:$0xff]  ;;  %s936_s24 = sshll.u32 %s217_s4, 2 }
  0x31   : > { %1032 = vmatpush3.xpose.msk.msra.mxu0 %vm319_vm0, %v241_v32  ;;  %1072 = vmatpush3.xpose.msk.msra.mxu1 %vm319_vm0, %v273_v33  ;;  %s219_s26 = scalar_lea.vmem [#allocation3], %s936_s24 }
  0x32   : > { %1033 = vmatprep.subr.msk.mxu0 %vm319_vm0, %v256_v34  ;;  %1073 = vmatprep.subr.msk.mxu1 %vm319_vm0, %v288_v35  ;;  %s873_s27 = sshll.u32 %s219_s26, 4  ;;  %s874_s27 = int_to_ptr.vmem [resolvable:$true] %s873_s27 }
  0x33   : > { %s1160_s11 = scalar_lea.vmem %s874_s27, 64  ;;  %p1167_p0 = scmp.lt.s32.totalorder %s874_s27, %s1165_s13 }
  0x34   : > { %p1161_p11 = scmp.ne.s32.totalorder %s874_s27, %s1160_s11  ;;  %p1168_p1 = scmp.lt.s32.totalorder %s1166_s14, %s1160_s11 }
  0x35   : > { %1034 = vmatpush3.xpose.msk.msra.mxu0 %vm319_vm0, %v240_v36  ;;  %1074 = vmatpush3.xpose.msk.msra.mxu1 %vm319_vm0, %v272_v37 }
  0x36   : > { %1035 = vmatprep.subr.msk.mxu0 %vm319_vm0, %v255_v38  ;;  %1075 = vmatprep.subr.msk.mxu1 %vm319_vm0, %v287_v39  ;;  %p1162_p12 = pnand %p1161_p11, %p1293_p5  ;;  %p1169_p2 = por %p1168_p1, %p1167_p0 }
  0x38   : > { %p1163_p13 = pneg %p1162_p12 }
  0x39   : > { %1036 = vmatpush3.xpose.msk.msra.mxu0 %vm319_vm0, %v239_v40  ;;  %1076 = vmatpush3.xpose.msk.msra.mxu1 %vm319_vm0, %v271_v41 }
  0x3a   : > { %1037 = vmatprep.subr.msk.mxu0 %vm319_vm0, %v254_v42  ;;  %1077 = vmatprep.subr.msk.mxu1 %vm319_vm0, %v286_v43  ;;  %p1170_p3 = pnand %p1169_p2, %p1163_p13 }
  0x3d   : > { %1038 = vmatpush3.xpose.msk.msra.mxu0 %vm319_vm0, %v238_v44  ;;  %1078 = vmatpush3.xpose.msk.msra.mxu1 %vm319_vm0, %v270_v45 }
  0x3e   : > { %1039 = vmatprep.subr.msk.mxu0 %vm319_vm0, %v253_v46  ;;  %1079 = vmatprep.subr.msk.mxu1 %vm319_vm0, %v285_v47 }
  0x41   : > { %1040 = vmatpush3.xpose.msk.msra.mxu0 %vm319_vm0, %v237_v48  ;;  %1080 = vmatpush3.xpose.msk.msra.mxu1 %vm319_vm0, %v269_v49 }
  0x42   : > { %1041 = vmatprep.subr.msk.mxu0 %vm319_vm0, %v252_v50  ;;  %1081 = vmatprep.subr.msk.mxu1 %vm319_vm0, %v284_v51 }
  0x45   : > { %1042 = vmatpush3.xpose.msk.msra.mxu0 %vm319_vm0, %v236_v52  ;;  %1082 = vmatpush3.xpose.msk.msra.mxu1 %vm319_vm0, %v268_v53 }
  0x46   : > { %1043 = vmatprep.subr.msk.mxu0 %vm319_vm0, %v251_v54  ;;  %1083 = vmatprep.subr.msk.mxu1 %vm319_vm0, %v283_v55 }
  0x49   : > { %1044 = vmatpush3.xpose.msk.msra.mxu0 %vm319_vm0, %v235_v56  ;;  %1084 = vmatpush3.xpose.msk.msra.mxu1 %vm319_vm0, %v267_v57 }
  0x4a   : > { %1045 = vmatprep.subr.msk.mxu0 %vm319_vm0, %v250_v58  ;;  %1085 = vmatprep.subr.msk.mxu1 %vm319_vm0, %v282_v59 }
  0x4d   : > { %1046 = vmatpush3.xpose.msk.msra.mxu0 %vm319_vm0, %v234_v60  ;;  %1086 = vmatpush3.xpose.msk.msra.mxu1 %vm319_vm0, %v266_v61 }
  0x4e   : > { %1047 = vmatprep.subr.msk.mxu0 %vm319_vm0, %v249_v62  ;;  %1087 = vmatprep.subr.msk.mxu1 %vm319_vm0, %v281_v63 }
  0x51   : > { %1048 = vmatpush3.xpose.msk.msra.mxu0 %vm319_vm0, %v233_v1  ;;  %1088 = vmatpush3.xpose.msk.msra.mxu1 %vm319_vm0, %v265_v2 }
  0x52   : > { %1049 = vmatprep.subr.msk.mxu0 %vm319_vm0, %v248_v3  ;;  %1089 = vmatprep.subr.msk.mxu1 %vm319_vm0, %v280_v4 }
  0x55   : > { %1050 = vmatpush3.xpose.msk.msra.mxu0 %vm319_vm0, %v232_v5  ;;  %1090 = vmatpush3.xpose.msk.msra.mxu1 %vm319_vm0, %v264_v6 }
  0x56   : > { %1051 = vmatprep.subr.msk.mxu0 %vm319_vm0, %v247_v7  ;;  %1091 = vmatprep.subr.msk.mxu1 %vm319_vm0, %v279_v8 }
  0x59   : > { %1052 = vmatpush3.xpose.msk.msra.mxu0 %vm319_vm0, %v231_v9  ;;  %1092 = vmatpush3.xpose.msk.msra.mxu1 %vm319_vm0, %v263_v10 }
  0x5c   : > { %1054 = vmatmul.mubr.msk.f32.vlgmr.msra.gmra.mxu0 %vm319_vm0, %v1308_v0  ;;  %1094 = vmatmul.mubr.msk.f32.vlgmr.msra.gmra.mxu1 %vm319_vm0, %v1308_v0  ;;  %v230_v0 = vld [vmem:[%s1533_s1 + $0x18] sm:$0xff] }
  0x5d   : > { %1055 = vmatprep.mubr.msk.f32.mxu0 %vm319_vm0, %v228_v11  ;;  %1095 = vmatprep.mubr.msk.f32.mxu1 %vm319_vm0, %v228_v11 }
  0x60   : > { %1056 = vmatmul.mubr.msk.f32.gmra.mxu0 %vm319_vm0, %v228_v11  ;;  %1096 = vmatmul.mubr.msk.f32.gmra.mxu1 %vm319_vm0, %v228_v11 }
  0x61   : > { %1057 = vmatprep.mubr.msk.f32.mxu0 %vm319_vm0, %v229_v12  ;;  %1097 = vmatprep.mubr.msk.f32.mxu1 %vm319_vm0, %v229_v12 }
  0x64   : > { %1058 = vmatmul.mubr.msk.f32.gmra.mxu0 %vm319_vm0, %v229_v12  ;;  %1098 = vmatmul.mubr.msk.f32.gmra.mxu1 %vm319_vm0, %v229_v12 }
  0x65   : > { %1059 = vmatprep.mubr.msk.f32.mxu0 %vm319_vm0, %v230_v0  ;;  %1099 = vmatprep.mubr.msk.f32.mxu1 %vm319_vm0, %v230_v0 }
  0x68   : > { %1060 = vmatmul.mubr.msk.f32.gmra.mxu0 %vm319_vm0, %v230_v0  ;;  %1100 = vmatmul.mubr.msk.f32.gmra.mxu1 %vm319_vm0, %v230_v0 }
  0x93   : > { %v302_v13 = vpop.permute.xlu0 %301  ;;  %v312_v14 = vpop.permute.xlu1 %311 }
  0x97   : > { %v307_v15 = vpop.permute.xlu0 %306  ;;  %v317_v22 = vpop.permute.xlu1 %316 }
  0x9b   : > { %v725_v27 = vpop.permute.xlu0 %724  ;;  %v730_v42 = vpop.permute.xlu1 %729 }
  0x9f   : > { %v735_v51 = vpop.permute.xlu0 %734 }
 0x11c   : > { %v590_v16 = vpop.f32.mrf.mxu0  ;;  %v679_v17 = vpop.f32.mrf.mxu1 }
 0x11d   : > { %v591_v18 = vadd.f32 %v590_v16, %v302_v13  ;;  %v680_v19 = vadd.f32 %v679_v17, %v302_v13  ;;  %v740_v16 = vpop.permute.xlu1 %739 }
 0x11e   : > { %v592_v20 = vpop.f32.mrf.mxu0  ;;  %v681_v21 = vpop.f32.mrf.mxu1 }
 0x11f   : > { %v593_v23 = vadd.f32 %v592_v20, %v302_v13  ;;  %v682_v24 = vadd.f32 %v681_v21, %v302_v13  ;;  %v702_v28 = vmax.f32 %v591_v18, 0.0  ;;  %v704_v29 = vmax.f32 %v680_v19, 0.0 }
 0x120   : > { %v596_v25 = vpop.f32.mrf.mxu0  ;;  %v685_v26 = vpop.f32.mrf.mxu1 }
 0x121   : > { %v597_v30 = vadd.f32 %v596_v25, %v307_v15  ;;  %v686_v31 = vadd.f32 %v685_v26, %v307_v15  ;;  %v703_v36 = vmax.f32 %v593_v23, 0.0  ;;  %v705_v37 = vmax.f32 %v682_v24, 0.0 }
 0x122   : > { %v598_v32 = vpop.f32.mrf.mxu0  ;;  %v687_v33 = vpop.f32.mrf.mxu1  ;;  %v742_v47 = vmul.f32 %v725_v27, %v702_v28  ;;  %v744_v48 = vmul.f32 %v725_v27, %v704_v29 }
 0x123   : > { %v599_v34 = vadd.f32 %v598_v32, %v307_v15  ;;  %v688_v35 = vadd.f32 %v687_v33, %v307_v15  ;;  %v706_v38 = vmax.f32 %v597_v30, 0.0  ;;  %v708_v39 = vmax.f32 %v686_v31, 0.0 }
 0x124   : > { %v602_v40 = vpop.f32.mrf.mxu0  ;;  %v691_v41 = vpop.f32.mrf.mxu1  ;;  %v743_v56 = vmul.f32 %v725_v27, %v703_v36  ;;  %v745_v57 = vmul.f32 %v725_v27, %v705_v37 }
 0x125   : > { %v707_v43 = vmax.f32 %v599_v34, 0.0  ;;  %v709_v44 = vmax.f32 %v688_v35, 0.0  ;;  %v603_v45 = vadd.f32 %v602_v40, %v312_v14  ;;  %v692_v46 = vadd.f32 %v691_v41, %v312_v14 }
 0x126   : > { %v604_v49 = vpop.f32.mrf.mxu0  ;;  %v693_v50 = vpop.f32.mrf.mxu1  ;;  %v746_v52 = vmul.f32 %v730_v42, %v706_v38  ;;  %v748_v53 = vmul.f32 %v730_v42, %v708_v39 }
 0x127   : > { %v710_v54 = vmax.f32 %v603_v45, 0.0  ;;  %v712_v55 = vmax.f32 %v692_v46, 0.0  ;;  %v605_v58 = vadd.f32 %v604_v49, %v312_v14  ;;  %v694_v59 = vadd.f32 %v693_v50, %v312_v14 }
 0x128   : > { %v608_v60 = vpop.f32.mrf.mxu0  ;;  %v697_v61 = vpop.f32.mrf.mxu1  ;;  %v747_v62 = vmul.f32 %v730_v42, %v707_v43  ;;  %v749_v63 = vmul.f32 %v730_v42, %v709_v44  ;;  %v758_v9 = vadd.f32 %v746_v52, %v742_v47  ;;  %v776_v10 = vadd.f32 %v748_v53, %v744_v48 }
 0x129   : > { %v750_v1 = vmul.f32 %v735_v51, %v710_v54  ;;  %v752_v2 = vmul.f32 %v735_v51, %v712_v55  ;;  %v711_v3 = vmax.f32 %v605_v58, 0.0  ;;  %v713_v4 = vmax.f32 %v694_v59, 0.0 }
 0x12a   : > { %v609_v5 = vadd.f32 %v608_v60, %v317_v22  ;;  %v698_v6 = vadd.f32 %v697_v61, %v317_v22  ;;  %v610_v7 = vpop.f32.mrf.mxu0  ;;  %v699_v8 = vpop.f32.mrf.mxu1  ;;  %v767_v17 = vadd.f32 %v747_v62, %v743_v56  ;;  %v785_v18 = vadd.f32 %v749_v63, %v745_v57 }
 0x12b   : > { %v611_v11 = vadd.f32 %v610_v7, %v317_v22  ;;  %v700_v12 = vadd.f32 %v699_v8, %v317_v22  ;;  %v751_v0 = vmul.f32 %v735_v51, %v711_v3  ;;  %v753_v13 = vmul.f32 %v735_v51, %v713_v4 }
 0x12c   : > { %v714_v15 = vmax.f32 %v609_v5, 0.0  ;;  %v716_v14 = vmax.f32 %v698_v6, 0.0  ;;  %v759_v21 = vadd.f32 %v758_v9, %v750_v1  ;;  %v777_v23 = vadd.f32 %v776_v10, %v752_v2 }
 0x12d   : > { %v715_v19 = vmax.f32 %v611_v11, 0.0  ;;  %v717_v20 = vmax.f32 %v700_v12, 0.0  ;;  %v768_v26 = vadd.f32 %v767_v17, %v751_v0  ;;  %v786_v27 = vadd.f32 %v785_v18, %v753_v13 }
 0x12e   : > { %v754_v24 = vmul.f32 %v740_v16, %v714_v15  ;;  %v756_v25 = vmul.f32 %v740_v16, %v716_v14  ;;  %v795_v51 = vstv %s794_s19  ;;  %v1223_v11 = vmov 1966171168  }
 0x12f   : > { %v755_v28 = vmul.f32 %v740_v16, %v715_v19  ;;  %v757_v29 = vmul.f32 %v740_v16, %v717_v20  ;;  %v831_v12 = vunpack.c.l.s4 %v1223_v11  ;;  %v833_v0 = vlaneseq }
 0x130   : > { %v760_v30 = vadd.f32 %v759_v21, %v754_v24  ;;  %v778_v31 = vadd.f32 %v777_v23, %v756_v25 }
 0x131   : > { %v769_v22 = vadd.f32 %v768_v26, %v755_v28  ;;  %v787_v32 = vadd.f32 %v786_v27, %v757_v29  ;;  %v832_v13 = vunpack.c.0.s8 %v831_v12  ;;  %v834_v15 = vshrl.u32 %v833_v0, 7 }
 0x132   : > { %v761_v33 = vrot.slane %v760_v30, 4  ;;  %v779_v34 = vrot.slane %v778_v31, 4  ;;  %vm855_vm1 = vcmp.lt.s32.totalorder %v833_v0, 512 }
 0x133   : > { %v770_v35 = vrot.slane %v769_v22, 4  ;;  %v788_v36 = vrot.slane %v787_v32, 4  ;;  %v835_v17 = vsub.s32 %v832_v13, %v834_v15 }
 0x134   : > { %v762_v37 = vadd.f32 %v761_v33, %v760_v30  ;;  %v780_v38 = vadd.f32 %v779_v34, %v778_v31 }
 0x135   : > { %v771_v39 = vadd.f32 %v770_v35, %v769_v22  ;;  %v789_v40 = vadd.f32 %v788_v36, %v787_v32 }
 0x136   : > { %v763_v41 = vrot.slane %v762_v37, 2  ;;  %v781_v42 = vrot.slane %v780_v38, 2 }
 0x137   : > { %v772_v43 = vrot.slane %v771_v39, 2  ;;  %v790_v44 = vrot.slane %v789_v40, 2 }
 0x138   : > { %v764_v45 = vadd.f32 %v763_v41, %v762_v37  ;;  %v782_v46 = vadd.f32 %v781_v42, %v780_v38 }
 0x139   : > { %v773_v47 = vadd.f32 %v772_v43, %v771_v39  ;;  %v791_v48 = vadd.f32 %v790_v44, %v789_v40 }
 0x13a   : > { %v765_v49 = vrot.slane %v764_v45, 1  ;;  %v783_v50 = vrot.slane %v782_v46, 1 }
 0x13b   : > { %v774_v52 = vrot.slane %v773_v47, 1  ;;  %v792_v53 = vrot.slane %v791_v48, 1 }
 0x13c   : > { %v766_v54 = vadd.f32 %v765_v49, %v764_v45  ;;  %v784_v55 = vadd.f32 %v783_v50, %v782_v46 }
 0x13d   : > { %v775_v56 = vadd.f32 %v774_v52, %v773_v47  ;;  %v793_v57 = vadd.f32 %v792_v53, %v791_v48 }
 0x13e   : > { %v796_v58 = vadd.f32 %v795_v51, %v766_v54  ;;  %v798_v59 = vadd.f32 %v795_v51, %v784_v55 }
 0x13f   : > { %v797_v60 = vadd.f32 %v795_v51, %v775_v56  ;;  %v799_v61 = vadd.f32 %v795_v51, %v793_v57 }
 0x140   : > { %v1011_v62 = vmul.f32 -1.442695, %v796_v58  ;;  %v1013_v63 = vmul.f32 -1.442695, %v798_v59 }
 0x141   : > { %v1012_v1 = vmul.f32 -1.442695, %v797_v60  ;;  %v1014_v2 = vmul.f32 -1.442695, %v799_v61 }
 0x142   : > { %1144 = vpow2.f32 %v1011_v62 }
 0x143   : > { %1146 = vpow2.f32 %v1013_v63 }
 0x144   : > { %1148 = vpow2.f32 %v1012_v1 }
 0x145   : > { %1150 = vpow2.f32 %v1014_v2 }
 0x14f   : > { %v1145_v3 = vpop.eup %1144 }
 0x150   : > { %v1147_v4 = vpop.eup %1146  ;;  %v812_v5 = vadd.f32 1.0, %v1145_v3 }
 0x151   : > { %v1149_v6 = vpop.eup %1148  ;;  %v814_v7 = vadd.f32 1.0, %v1147_v4 }
 0x152   : > { %v1151_v8 = vpop.eup %1150  ;;  %1152 = vrcp.f32 %v812_v5  ;;  %v813_v9 = vadd.f32 1.0, %v1149_v6 }
 0x153   : > { %1154 = vrcp.f32 %v814_v7  ;;  %v815_v10 = vadd.f32 1.0, %v1151_v8 }
 0x154   : > { %1156 = vrcp.f32 %v813_v9 }
 0x155   : > { %1158 = vrcp.f32 %v815_v10 }
 0x15f   : > { %v1153_v14 = vpop.eup %1152 }
 0x160   : > { %v1155_v16 = vpop.eup %1154 }
 0x161   : > { %v1157_v18 = vpop.eup %1156 }
 0x162   : > { %v1159_v19 = vpop.eup %1158  ;;  %v828_v20 = vcombine.low %v1153_v14, %v1157_v18 }
 0x163   : > { %v829_v21 = vcombine.low %v1155_v16, %v1159_v19 }
 0x164   : > { %v836_v23 = vrot.slane %v828_v20, %v835_v17 }
 0x165   : > { %v843_v24 = vrot.slane %v829_v21, %v835_v17 }
 0x167   : > { %v844_v25 = vcombine.low %v836_v23, %v843_v24 }
 0x169   : > { %v851_v26 = vrot.slane %v844_v25, %v835_v17 }
 0x16b   : > { %857 = vst.msk [vmem:[%s219_s26] sm:$0xf] %vm855_vm1, %v851_v26 }
 0x16c   : > { %1173 = shalt.err (!%p1170_p3)
}
 0x16d   : > { %s1174_s15 = scalar_lea.hbm %s871_s9, 64  ;;  %s1178_s17 = scalar_lea.hbm %s1537_s5, 128 }
 0x16e   : > { %p1175_p4 = scmp.ne.s32.totalorder %s871_s9, %s1174_s15  ;;  %p1179_p9 = scmp.lt.s32.totalorder %s871_s9, %s1537_s5 }
 0x16f   : > { %p1180_p10 = scmp.lt.s32.totalorder %s1178_s17, %s1174_s15 }
 0x170   : > { %p1176_p7 = pnand %p1175_p4, %p1293_p5 }
 0x171   : > { %p1181_p11 = por %p1180_p10, %p1179_p9 }
 0x172   : > { %p1177_p8 = pneg %p1176_p7 }
 0x174   : > { %p1182_p12 = pnand %p1181_p11, %p1177_p8 }
 0x176   : > { %1185 = shalt.err (!%p1182_p12)
}
 0x177   : > { %1101 = dma.vmem_to_hbm [thread:$0]  (%p1293_p5), %s874_s27, 64, %s871_s9, %s859_s10  }
 0x178 PF: > { %p1107_p13 = scmp.ge.s32.totalorder %s1220_s23, 2  ;;  %s885_s4 = sand.u32 1, %s1208_s20  }
 0x179   : > { %s886_s24 = scalar_lea.sflag [#allocation4], %s885_s4 }
 0x17a   : > { %p1104_p0 = pnand %p1107_p13, %p1297_p6 }
 0x17c   : > { %p1105_p1 = pneg %p1104_p0 }
 0x17e   : > { %1203 = dma.done.wait (%p1105_p1), %s886_s24, 64  }
 0x17f   : > { %1205 = vsyncadd (%p1105_p1), %s886_s24, 4294967232  ;;  %p16_p2 = scmp.ge.s32.totalorder %s1281_s25, 4   ;;  %s1540_s20 = smov %s1212_s21 }
 0x180   : > { %s1541_s21 = smov %s1216_s22  ;;  %s1542_s22 = smov %s1291_s28 }
 0x181   : > { %s1543_s23 = smov %s1281_s25  ;;  %18 = sbr.rel (!%p16_p2) target bundleno = 5 (0x5), region = 75 }
 0x186   :  { %891 = vsyncpa [#allocation4], 1 }
 0x187   :  { %893 = vsyncpa [#allocation4 + $0x1], 1 }

</bundles_post_ra>
